<compile_context>
chip_gen: v5e
topology: v5e:2x2
jax: 0.10.0
libtpu: 0.0.40
codegen_flags: <defaults>
</compile_context>

<pallas_src>
import jax
import jax.numpy as jnp
from jax.experimental import pallas as pl
from jax.experimental.pallas import tpu as pltpu


_CH = 8  # sublane-aligned chunk of the in_features axis inside the kernel


def _round_up(n: int, m: int) -> int:
    return ((n + m - 1) // m) * m


def _cdiv(a: int, b: int) -> int:
    return -(-a // b)


def _quasi_kernel(x_ref, wt_ref, o_ref, acc_ref, s_ref):
    """One (TB, TO) output tile, accumulating the product over in_features.

    x_ref:   (TB, TI)  input chunk      (batch on sublanes, in_features on lanes)
    wt_ref:  (TI, TO)  W^T chunk        (in_features on sublanes, out_features on lanes)
    o_ref:   (TB, TO)  output tile      (lane-dense over out_features)
    acc_ref: (TB, TO)  f32 running-product accumulator (VMEM scratch)
    s_ref:   (TI, TO)  f32 sigmoid(W^T) staging buffer  (VMEM scratch)
    """
    k = pl.program_id(2)

    @pl.when(k == 0)
    def _init():
        acc_ref[...] = jnp.ones(acc_ref.shape, acc_ref.dtype)

    # Per-grid-step precompute.  sigmoid goes to the EUP and is staged through
    # VMEM so the (TI, TO) tile is never register-resident.
    s_ref[...] = jax.nn.sigmoid(wt_ref[...].astype(jnp.float32))      # (TI, TO)
    omx = 1.0 - x_ref[...].astype(jnp.float32)                        # (TB, TI), small

    acc = acc_ref[...]                                                # (TB, TO), capped ~16 vregs
    ti = wt_ref.shape[0]
    # Rank-1 running product.  Static chunk loop: s rows are re-loaded per
    # chunk from VMEM scratch (cheap vlds), x columns are static lane slices
    # of the small register-resident omx tile.
    for c in range(ti // _CH):
        s_chunk = s_ref[pl.ds(c * _CH, _CH), :]                       # (8, TO) load
        for u in range(_CH):
            j = c * _CH + u
            # factor[b, o] = 1 - (1 - x[b, j]) * sigmoid(W[o, j])
            acc = acc * (1.0 - omx[:, j:j + 1] * s_chunk[u:u + 1, :])
    acc_ref[...] = acc

    @pl.when(k == pl.num_programs(2) - 1)
    def _finalize():
        o_ref[...] = acc_ref[...].astype(o_ref.dtype)


def quasi_selflearn_forward(x, weight, *, acc_budget_elems=16384, max_lane_tile=1024):
    """out[b, o] = prod_i (1 - sigmoid(W[o, i]) * (1 - x[b, i]))."""
    if x.ndim == 1:                    # torch unsqueezes to (1, 1, I) -> out (1, O)
        x = x[None, :]
    assert x.ndim == 2, "wrapper supports (B, in_features) or (in_features,) inputs"
    B, I = x.shape
    O, I2 = weight.shape
    assert I == I2, "in_features mismatch"
    out_dtype = jnp.result_type(x.dtype, weight.dtype)

    # ---- tile selection ---------------------------------------------------
    # Batch (sublane) tile: exactly round_up(B, 8) for small/medium B (no
    # whole-tile pad waste); for large B split evenly into ~128-row tiles so
    # the register-resident accumulator and (1 - x) tiles stay small.
    b8 = _round_up(max(B, 1), 8)
    if b8 <= 256:
        TB, Bp = b8, b8
    else:
        n_b = _cdiv(b8, 128)
        TB = _round_up(_cdiv(b8, n_b), 8)
        Bp = TB * n_b

    # Out-features (lane) tile: multiple of 128, sized so the (TB, TO) f32
    # accumulator stays ~<=16 vregs, split evenly over O to minimise pad
    # columns.  Small batch => large TO (long unmasked stores, grid-step
    # overhead amortised over more work).
    o128 = _round_up(max(O, 1), 128)
    to_budget = max(128, ((acc_budget_elems // TB) // 128) * 128)
    to_target = min(o128, to_budget, max_lane_tile)
    n_o = _cdiv(o128, to_target)
    TO = _round_up(_cdiv(o128, n_o), 128)
    Op = TO * n_o

    # In-features chunk (static unroll length inside the kernel): one
    # sublane-aligned chunk of up to 128 rows; the remainder of the reduction
    # runs on the innermost ("arbitrary") grid axis with the VMEM accumulator.
    i8 = _round_up(max(I, 1), 8)
    TI = i8 if i8 <= 128 else 128
    Ip = _round_up(I, TI)

    # ---- padding: in_features pads use the multiplicative identity x = 1 ----
    x_p = x
    if Ip != I:
        x_p = jnp.pad(x_p, ((0, 0), (0, Ip - I)), constant_values=1.0)
    if Bp != B:
        x_p = jnp.pad(x_p, ((0, Bp - B), (0, 0)))
    # NOTE: for production use, store the weight pre-transposed/padded as
    # (in_features, out_features) so this transpose+pad does not re-read the
    # whole weight from HBM on every forward.
    wt = weight.T                                              # (I, O): lane-dense over O
    if (Ip != I) or (Op != O):
        wt = jnp.pad(wt, ((0, Ip - I), (0, Op - O)))

    grid = (Bp // TB, Op // TO, Ip // TI)

    out = pl.pallas_call(
        _quasi_kernel,
        out_shape=jax.ShapeDtypeStruct((Bp, Op), out_dtype),
        grid_spec=pltpu.PrefetchScalarGridSpec(
            num_scalar_prefetch=0,
            grid=grid,
            in_specs=[
                pl.BlockSpec((TB, TI), lambda b, o, k: (b, k)),   # x
                pl.BlockSpec((TI, TO), lambda b, o, k: (k, o)),   # weight.T
            ],
            out_specs=pl.BlockSpec((TB, TO), lambda b, o, k: (b, o)),
            scratch_shapes=[
                pltpu.VMEM((TB, TO), jnp.float32),   # running product
                pltpu.VMEM((TI, TO), jnp.float32),   # sigmoid(W^T) staging
            ],
        ),
        compiler_params=pltpu.CompilerParams(
            # batch/out tiles are independent -> "parallel"; the in_features
            # reduction axis is innermost and "arbitrary" so the accumulator
            # is carried across it.
            # TODO(synk): on v7x, pltpu.CORE_PARALLEL on the out axis can force
            # an explicit 2-TensorCore split when the grid is large enough.
            dimension_semantics=("parallel", "parallel", "arbitrary"),
            vmem_limit_bytes=32 * 1024 * 1024,
        ),
    )(x_p, wt)

    return out[:B, :O]


def quasi_selflearn_ref(x, weight):
    """Pure-JAX reference matching the PyTorch forward exactly."""
    if x.ndim == 1:
        x = x[None, :]
    h = 1.0 - jax.nn.sigmoid(weight) * (1.0 - x[:, None, :])   # (B, O, I)
    return jnp.prod(h, axis=2)                                  # (B, O)


# TODO(synk): learning()/delta_quasi() are training-rule methods (not part of
# forward, and they reference undefined attributes in the original module), so
# they are intentionally not implemented here.

if __name__ == "__main__":
    key = jax.random.PRNGKey(0)
    k_w, k_x = jax.random.split(key)

    batch = 2
    in_features = 32
    out_features = 256

    # deterministic init mirroring nn.init.trunc_normal_(mean=0, std=1, a=-2, b=2)
    weight = jax.random.truncated_normal(
        k_w, -2.0, 2.0, (out_features, in_features), dtype=jnp.float32)
    x = jax.random.normal(k_x, (batch, in_features), dtype=jnp.float32)

    fwd = jax.jit(quasi_selflearn_forward)
    out = fwd(x, weight)
    out = jax.block_until_ready(out)

    ref = quasi_selflearn_ref(x, weight)
    assert out.shape == (batch, out_features)
    assert jnp.allclose(out, ref, rtol=1e-4, atol=1e-5), "mismatch vs reference"

    print("KERNEL_OK")
</pallas_src>

<mosaic_0001>
module attributes {stable_mosaic.version = 11 : i64} {
  func.func @_quasi_kernel(%arg0: i32, %arg1: i32, %arg2: i32, %arg3: memref<8x32xf32, #tpu.memory_space<vmem>>, %arg4: memref<32x256xf32, #tpu.memory_space<vmem>>, %arg5: memref<8x256xf32, #tpu.memory_space<vmem>>, %arg6: memref<8x256xf32, #tpu.memory_space<vmem>>, %arg7: memref<32x256xf32, #tpu.memory_space<vmem>>) attributes {dimension_semantics = [#tpu.dimension_semantics<parallel>, #tpu.dimension_semantics<parallel>, #tpu.dimension_semantics<arbitrary>], iteration_bounds = array<i64: 1, 1, 1>, scalar_prefetch = 0 : i64, scratch_operands = 2 : i64, tpu.core_type = #tpu.core_type<tc>, window_params = [{transform_indices = @transform_0, window_bounds = array<i64: 8, 32>}, {transform_indices = @transform_1, window_bounds = array<i64: 32, 256>}, {transform_indices = @transform_2, window_bounds = array<i64: 8, 256>}]} {
    %c0_i32 = arith.constant 0 : i32
    %0 = arith.cmpi eq, %arg2, %c0_i32 : i32
    %1 = arith.extui %0 : i1 to i32
    %c0_i32_0 = arith.constant 0 : i32
    %2 = arith.cmpi ne, %1, %c0_i32_0 : i32
    scf.if %2 {
      %cst_50 = arith.constant 1.000000e+00 : f32
      %278 = vector.broadcast %cst_50 : f32 to vector<8x256xf32>
      %c0_51 = arith.constant 0 : index
      %c0_52 = arith.constant 0 : index
      %279 = vector.load %arg6[%c0_51, %c0_52] : memref<8x256xf32, #tpu.memory_space<vmem>>, vector<8x256xf32>
      tpu.vector_store %arg6[%c0_51, %c0_52], %278 {strides = array<i32>} : memref<8x256xf32, #tpu.memory_space<vmem>>, vector<8x256xf32>,
    } else {
    }
    %c0 = arith.constant 0 : index
    %c0_1 = arith.constant 0 : index
    %3 = vector.load %arg4[%c0, %c0_1] : memref<32x256xf32, #tpu.memory_space<vmem>>, vector<32x256xf32>
    %4 = arith.negf %3 : vector<32x256xf32>
    %5 = math.exp %4 : vector<32x256xf32>
    %cst = arith.constant 1.000000e+00 : f32
    %6 = vector.broadcast %cst : f32 to vector<32x256xf32>
    %7 = arith.addf %6, %5 : vector<32x256xf32>
    %8 = arith.divf %6, %7 : vector<32x256xf32>
    %c0_2 = arith.constant 0 : index
    %c0_3 = arith.constant 0 : index
    %9 = vector.load %arg7[%c0_2, %c0_3] : memref<32x256xf32, #tpu.memory_space<vmem>>, vector<32x256xf32>
    tpu.vector_store %arg7[%c0_2, %c0_3], %8 {strides = array<i32>} : memref<32x256xf32, #tpu.memory_space<vmem>>, vector<32x256xf32>,
    %c0_4 = arith.constant 0 : index
    %c0_5 = arith.constant 0 : index
    %10 = vector.load %arg3[%c0_4, %c0_5] : memref<8x32xf32, #tpu.memory_space<vmem>>, vector<8x32xf32>
    %cst_6 = arith.constant 1.000000e+00 : f32
    %11 = vector.broadcast %cst_6 : f32 to vector<8x32xf32>
    %12 = arith.subf %11, %10 : vector<8x32xf32>
    %c0_7 = arith.constant 0 : index
    %c0_8 = arith.constant 0 : index
    %13 = vector.load %arg6[%c0_7, %c0_8] : memref<8x256xf32, #tpu.memory_space<vmem>>, vector<8x256xf32>
    %c0_9 = arith.constant 0 : index
    %c0_10 = arith.constant 0 : index
    %14 = vector.load %arg7[%c0_9, %c0_10] : memref<32x256xf32, #tpu.memory_space<vmem>>, vector<8x256xf32>
    %15 = vector.extract_strided_slice %12 {offsets = [0, 0], sizes = [8, 1], strides = [1, 1]} : vector<8x32xf32> to vector<8x1xf32>
    %16 = vector.extract_strided_slice %14 {offsets = [0, 0], sizes = [1, 256], strides = [1, 1]} : vector<8x256xf32> to vector<1x256xf32>
    %17 = vector.broadcast %15 : vector<8x1xf32> to vector<8x256xf32>
    %18 = vector.broadcast %16 : vector<1x256xf32> to vector<8x256xf32>
    %19 = arith.mulf %17, %18 : vector<8x256xf32>
    %cst_11 = arith.constant 1.000000e+00 : f32
    %20 = vector.broadcast %cst_11 : f32 to vector<8x256xf32>
    %21 = arith.subf %20, %19 : vector<8x256xf32>
    %22 = arith.mulf %13, %21 : vector<8x256xf32>
    %23 = vector.extract_strided_slice %12 {offsets = [0, 1], sizes = [8, 1], strides = [1, 1]} : vector<8x32xf32> to vector<8x1xf32>
    %24 = vector.extract_strided_slice %14 {offsets = [1, 0], sizes = [1, 256], strides = [1, 1]} : vector<8x256xf32> to vector<1x256xf32>
    %25 = vector.broadcast %23 : vector<8x1xf32> to vector<8x256xf32>
    %26 = vector.broadcast %24 : vector<1x256xf32> to vector<8x256xf32>
    %27 = arith.mulf %25, %26 : vector<8x256xf32>
    %cst_12 = arith.constant 1.000000e+00 : f32
    %28 = vector.broadcast %cst_12 : f32 to vector<8x256xf32>
    %29 = arith.subf %28, %27 : vector<8x256xf32>
    %30 = arith.mulf %22, %29 : vector<8x256xf32>
    %31 = vector.extract_strided_slice %12 {offsets = [0, 2], sizes = [8, 1], strides = [1, 1]} : vector<8x32xf32> to vector<8x1xf32>
    %32 = vector.extract_strided_slice %14 {offsets = [2, 0], sizes = [1, 256], strides = [1, 1]} : vector<8x256xf32> to vector<1x256xf32>
    %33 = vector.broadcast %31 : vector<8x1xf32> to vector<8x256xf32>
    %34 = vector.broadcast %32 : vector<1x256xf32> to vector<8x256xf32>
    %35 = arith.mulf %33, %34 : vector<8x256xf32>
    %cst_13 = arith.constant 1.000000e+00 : f32
    %36 = vector.broadcast %cst_13 : f32 to vector<8x256xf32>
    %37 = arith.subf %36, %35 : vector<8x256xf32>
    %38 = arith.mulf %30, %37 : vector<8x256xf32>
    %39 = vector.extract_strided_slice %12 {offsets = [0, 3], sizes = [8, 1], strides = [1, 1]} : vector<8x32xf32> to vector<8x1xf32>
    %40 = vector.extract_strided_slice %14 {offsets = [3, 0], sizes = [1, 256], strides = [1, 1]} : vector<8x256xf32> to vector<1x256xf32>
    %41 = vector.broadcast %39 : vector<8x1xf32> to vector<8x256xf32>
    %42 = vector.broadcast %40 : vector<1x256xf32> to vector<8x256xf32>
    %43 = arith.mulf %41, %42 : vector<8x256xf32>
    %cst_14 = arith.constant 1.000000e+00 : f32
    %44 = vector.broadcast %cst_14 : f32 to vector<8x256xf32>
    %45 = arith.subf %44, %43 : vector<8x256xf32>
    %46 = arith.mulf %38, %45 : vector<8x256xf32>
    %47 = vector.extract_strided_slice %12 {offsets = [0, 4], sizes = [8, 1], strides = [1, 1]} : vector<8x32xf32> to vector<8x1xf32>
    %48 = vector.extract_strided_slice %14 {offsets = [4, 0], sizes = [1, 256], strides = [1, 1]} : vector<8x256xf32> to vector<1x256xf32>
    %49 = vector.broadcast %47 : vector<8x1xf32> to vector<8x256xf32>
    %50 = vector.broadcast %48 : vector<1x256xf32> to vector<8x256xf32>
    %51 = arith.mulf %49, %50 : vector<8x256xf32>
    %cst_15 = arith.constant 1.000000e+00 : f32
    %52 = vector.broadcast %cst_15 : f32 to vector<8x256xf32>
    %53 = arith.subf %52, %51 : vector<8x256xf32>
    %54 = arith.mulf %46, %53 : vector<8x256xf32>
    %55 = vector.extract_strided_slice %12 {offsets = [0, 5], sizes = [8, 1], strides = [1, 1]} : vector<8x32xf32> to vector<8x1xf32>
    %56 = vector.extract_strided_slice %14 {offsets = [5, 0], sizes = [1, 256], strides = [1, 1]} : vector<8x256xf32> to vector<1x256xf32>
    %57 = vector.broadcast %55 : vector<8x1xf32> to vector<8x256xf32>
    %58 = vector.broadcast %56 : vector<1x256xf32> to vector<8x256xf32>
    %59 = arith.mulf %57, %58 : vector<8x256xf32>
    %cst_16 = arith.constant 1.000000e+00 : f32
    %60 = vector.broadcast %cst_16 : f32 to vector<8x256xf32>
    %61 = arith.subf %60, %59 : vector<8x256xf32>
    %62 = arith.mulf %54, %61 : vector<8x256xf32>
    %63 = vector.extract_strided_slice %12 {offsets = [0, 6], sizes = [8, 1], strides = [1, 1]} : vector<8x32xf32> to vector<8x1xf32>
    %64 = vector.extract_strided_slice %14 {offsets = [6, 0], sizes = [1, 256], strides = [1, 1]} : vector<8x256xf32> to vector<1x256xf32>
    %65 = vector.broadcast %63 : vector<8x1xf32> to vector<8x256xf32>
    %66 = vector.broadcast %64 : vector<1x256xf32> to vector<8x256xf32>
    %67 = arith.mulf %65, %66 : vector<8x256xf32>
    %cst_17 = arith.constant 1.000000e+00 : f32
    %68 = vector.broadcast %cst_17 : f32 to vector<8x256xf32>
    %69 = arith.subf %68, %67 : vector<8x256xf32>
    %70 = arith.mulf %62, %69 : vector<8x256xf32>
    %71 = vector.extract_strided_slice %12 {offsets = [0, 7], sizes = [8, 1], strides = [1, 1]} : vector<8x32xf32> to vector<8x1xf32>
    %72 = vector.extract_strided_slice %14 {offsets = [7, 0], sizes = [1, 256], strides = [1, 1]} : vector<8x256xf32> to vector<1x256xf32>
    %73 = vector.broadcast %71 : vector<8x1xf32> to vector<8x256xf32>
    %74 = vector.broadcast %72 : vector<1x256xf32> to vector<8x256xf32>
    %75 = arith.mulf %73, %74 : vector<8x256xf32>
    %cst_18 = arith.constant 1.000000e+00 : f32
    %76 = vector.broadcast %cst_18 : f32 to vector<8x256xf32>
    %77 = arith.subf %76, %75 : vector<8x256xf32>
    %78 = arith.mulf %70, %77 : vector<8x256xf32>
    %c8 = arith.constant 8 : index
    %c0_19 = arith.constant 0 : index
    %79 = vector.load %arg7[%c8, %c0_19] : memref<32x256xf32, #tpu.memory_space<vmem>>, vector<8x256xf32>
    %80 = vector.extract_strided_slice %12 {offsets = [0, 8], sizes = [8, 1], strides = [1, 1]} : vector<8x32xf32> to vector<8x1xf32>
    %81 = vector.extract_strided_slice %79 {offsets = [0, 0], sizes = [1, 256], strides = [1, 1]} : vector<8x256xf32> to vector<1x256xf32>
    %82 = vector.broadcast %80 : vector<8x1xf32> to vector<8x256xf32>
    %83 = vector.broadcast %81 : vector<1x256xf32> to vector<8x256xf32>
    %84 = arith.mulf %82, %83 : vector<8x256xf32>
    %cst_20 = arith.constant 1.000000e+00 : f32
    %85 = vector.broadcast %cst_20 : f32 to vector<8x256xf32>
    %86 = arith.subf %85, %84 : vector<8x256xf32>
    %87 = arith.mulf %78, %86 : vector<8x256xf32>
    %88 = vector.extract_strided_slice %12 {offsets = [0, 9], sizes = [8, 1], strides = [1, 1]} : vector<8x32xf32> to vector<8x1xf32>
    %89 = vector.extract_strided_slice %79 {offsets = [1, 0], sizes = [1, 256], strides = [1, 1]} : vector<8x256xf32> to vector<1x256xf32>
    %90 = vector.broadcast %88 : vector<8x1xf32> to vector<8x256xf32>
    %91 = vector.broadcast %89 : vector<1x256xf32> to vector<8x256xf32>
    %92 = arith.mulf %90, %91 : vector<8x256xf32>
    %cst_21 = arith.constant 1.000000e+00 : f32
    %93 = vector.broadcast %cst_21 : f32 to vector<8x256xf32>
    %94 = arith.subf %93, %92 : vector<8x256xf32>
    %95 = arith.mulf %87, %94 : vector<8x256xf32>
    %96 = vector.extract_strided_slice %12 {offsets = [0, 10], sizes = [8, 1], strides = [1, 1]} : vector<8x32xf32> to vector<8x1xf32>
    %97 = vector.extract_strided_slice %79 {offsets = [2, 0], sizes = [1, 256], strides = [1, 1]} : vector<8x256xf32> to vector<1x256xf32>
    %98 = vector.broadcast %96 : vector<8x1xf32> to vector<8x256xf32>
    %99 = vector.broadcast %97 : vector<1x256xf32> to vector<8x256xf32>
    %100 = arith.mulf %98, %99 : vector<8x256xf32>
    %cst_22 = arith.constant 1.000000e+00 : f32
    %101 = vector.broadcast %cst_22 : f32 to vector<8x256xf32>
    %102 = arith.subf %101, %100 : vector<8x256xf32>
    %103 = arith.mulf %95, %102 : vector<8x256xf32>
    %104 = vector.extract_strided_slice %12 {offsets = [0, 11], sizes = [8, 1], strides = [1, 1]} : vector<8x32xf32> to vector<8x1xf32>
    %105 = vector.extract_strided_slice %79 {offsets = [3, 0], sizes = [1, 256], strides = [1, 1]} : vector<8x256xf32> to vector<1x256xf32>
    %106 = vector.broadcast %104 : vector<8x1xf32> to vector<8x256xf32>
    %107 = vector.broadcast %105 : vector<1x256xf32> to vector<8x256xf32>
    %108 = arith.mulf %106, %107 : vector<8x256xf32>
    %cst_23 = arith.constant 1.000000e+00 : f32
    %109 = vector.broadcast %cst_23 : f32 to vector<8x256xf32>
    %110 = arith.subf %109, %108 : vector<8x256xf32>
    %111 = arith.mulf %103, %110 : vector<8x256xf32>
    %112 = vector.extract_strided_slice %12 {offsets = [0, 12], sizes = [8, 1], strides = [1, 1]} : vector<8x32xf32> to vector<8x1xf32>
    %113 = vector.extract_strided_slice %79 {offsets = [4, 0], sizes = [1, 256], strides = [1, 1]} : vector<8x256xf32> to vector<1x256xf32>
    %114 = vector.broadcast %112 : vector<8x1xf32> to vector<8x256xf32>
    %115 = vector.broadcast %113 : vector<1x256xf32> to vector<8x256xf32>
    %116 = arith.mulf %114, %115 : vector<8x256xf32>
    %cst_24 = arith.constant 1.000000e+00 : f32
    %117 = vector.broadcast %cst_24 : f32 to vector<8x256xf32>
    %118 = arith.subf %117, %116 : vector<8x256xf32>
    %119 = arith.mulf %111, %118 : vector<8x256xf32>
    %120 = vector.extract_strided_slice %12 {offsets = [0, 13], sizes = [8, 1], strides = [1, 1]} : vector<8x32xf32> to vector<8x1xf32>
    %121 = vector.extract_strided_slice %79 {offsets = [5, 0], sizes = [1, 256], strides = [1, 1]} : vector<8x256xf32> to vector<1x256xf32>
    %122 = vector.broadcast %120 : vector<8x1xf32> to vector<8x256xf32>
    %123 = vector.broadcast %121 : vector<1x256xf32> to vector<8x256xf32>
    %124 = arith.mulf %122, %123 : vector<8x256xf32>
    %cst_25 = arith.constant 1.000000e+00 : f32
    %125 = vector.broadcast %cst_25 : f32 to vector<8x256xf32>
    %126 = arith.subf %125, %124 : vector<8x256xf32>
    %127 = arith.mulf %119, %126 : vector<8x256xf32>
    %128 = vector.extract_strided_slice %12 {offsets = [0, 14], sizes = [8, 1], strides = [1, 1]} : vector<8x32xf32> to vector<8x1xf32>
    %129 = vector.extract_strided_slice %79 {offsets = [6, 0], sizes = [1, 256], strides = [1, 1]} : vector<8x256xf32> to vector<1x256xf32>
    %130 = vector.broadcast %128 : vector<8x1xf32> to vector<8x256xf32>
    %131 = vector.broadcast %129 : vector<1x256xf32> to vector<8x256xf32>
    %132 = arith.mulf %130, %131 : vector<8x256xf32>
    %cst_26 = arith.constant 1.000000e+00 : f32
    %133 = vector.broadcast %cst_26 : f32 to vector<8x256xf32>
    %134 = arith.subf %133, %132 : vector<8x256xf32>
    %135 = arith.mulf %127, %134 : vector<8x256xf32>
    %136 = vector.extract_strided_slice %12 {offsets = [0, 15], sizes = [8, 1], strides = [1, 1]} : vector<8x32xf32> to vector<8x1xf32>
    %137 = vector.extract_strided_slice %79 {offsets = [7, 0], sizes = [1, 256], strides = [1, 1]} : vector<8x256xf32> to vector<1x256xf32>
    %138 = vector.broadcast %136 : vector<8x1xf32> to vector<8x256xf32>
    %139 = vector.broadcast %137 : vector<1x256xf32> to vector<8x256xf32>
    %140 = arith.mulf %138, %139 : vector<8x256xf32>
    %cst_27 = arith.constant 1.000000e+00 : f32
    %141 = vector.broadcast %cst_27 : f32 to vector<8x256xf32>
    %142 = arith.subf %141, %140 : vector<8x256xf32>
    %143 = arith.mulf %135, %142 : vector<8x256xf32>
    %c16 = arith.constant 16 : index
    %c0_28 = arith.constant 0 : index
    %144 = vector.load %arg7[%c16, %c0_28] : memref<32x256xf32, #tpu.memory_space<vmem>>, vector<8x256xf32>
    %145 = vector.extract_strided_slice %12 {offsets = [0, 16], sizes = [8, 1], strides = [1, 1]} : vector<8x32xf32> to vector<8x1xf32>
    %146 = vector.extract_strided_slice %144 {offsets = [0, 0], sizes = [1, 256], strides = [1, 1]} : vector<8x256xf32> to vector<1x256xf32>
    %147 = vector.broadcast %145 : vector<8x1xf32> to vector<8x256xf32>
    %148 = vector.broadcast %146 : vector<1x256xf32> to vector<8x256xf32>
    %149 = arith.mulf %147, %148 : vector<8x256xf32>
    %cst_29 = arith.constant 1.000000e+00 : f32
    %150 = vector.broadcast %cst_29 : f32 to vector<8x256xf32>
    %151 = arith.subf %150, %149 : vector<8x256xf32>
    %152 = arith.mulf %143, %151 : vector<8x256xf32>
    %153 = vector.extract_strided_slice %12 {offsets = [0, 17], sizes = [8, 1], strides = [1, 1]} : vector<8x32xf32> to vector<8x1xf32>
    %154 = vector.extract_strided_slice %144 {offsets = [1, 0], sizes = [1, 256], strides = [1, 1]} : vector<8x256xf32> to vector<1x256xf32>
    %155 = vector.broadcast %153 : vector<8x1xf32> to vector<8x256xf32>
    %156 = vector.broadcast %154 : vector<1x256xf32> to vector<8x256xf32>
    %157 = arith.mulf %155, %156 : vector<8x256xf32>
    %cst_30 = arith.constant 1.000000e+00 : f32
    %158 = vector.broadcast %cst_30 : f32 to vector<8x256xf32>
    %159 = arith.subf %158, %157 : vector<8x256xf32>
    %160 = arith.mulf %152, %159 : vector<8x256xf32>
    %161 = vector.extract_strided_slice %12 {offsets = [0, 18], sizes = [8, 1], strides = [1, 1]} : vector<8x32xf32> to vector<8x1xf32>
    %162 = vector.extract_strided_slice %144 {offsets = [2, 0], sizes = [1, 256], strides = [1, 1]} : vector<8x256xf32> to vector<1x256xf32>
    %163 = vector.broadcast %161 : vector<8x1xf32> to vector<8x256xf32>
    %164 = vector.broadcast %162 : vector<1x256xf32> to vector<8x256xf32>
    %165 = arith.mulf %163, %164 : vector<8x256xf32>
    %cst_31 = arith.constant 1.000000e+00 : f32
    %166 = vector.broadcast %cst_31 : f32 to vector<8x256xf32>
    %167 = arith.subf %166, %165 : vector<8x256xf32>
    %168 = arith.mulf %160, %167 : vector<8x256xf32>
    %169 = vector.extract_strided_slice %12 {offsets = [0, 19], sizes = [8, 1], strides = [1, 1]} : vector<8x32xf32> to vector<8x1xf32>
    %170 = vector.extract_strided_slice %144 {offsets = [3, 0], sizes = [1, 256], strides = [1, 1]} : vector<8x256xf32> to vector<1x256xf32>
    %171 = vector.broadcast %169 : vector<8x1xf32> to vector<8x256xf32>
    %172 = vector.broadcast %170 : vector<1x256xf32> to vector<8x256xf32>
    %173 = arith.mulf %171, %172 : vector<8x256xf32>
    %cst_32 = arith.constant 1.000000e+00 : f32
    %174 = vector.broadcast %cst_32 : f32 to vector<8x256xf32>
    %175 = arith.subf %174, %173 : vector<8x256xf32>
    %176 = arith.mulf %168, %175 : vector<8x256xf32>
    %177 = vector.extract_strided_slice %12 {offsets = [0, 20], sizes = [8, 1], strides = [1, 1]} : vector<8x32xf32> to vector<8x1xf32>
    %178 = vector.extract_strided_slice %144 {offsets = [4, 0], sizes = [1, 256], strides = [1, 1]} : vector<8x256xf32> to vector<1x256xf32>
    %179 = vector.broadcast %177 : vector<8x1xf32> to vector<8x256xf32>
    %180 = vector.broadcast %178 : vector<1x256xf32> to vector<8x256xf32>
    %181 = arith.mulf %179, %180 : vector<8x256xf32>
    %cst_33 = arith.constant 1.000000e+00 : f32
    %182 = vector.broadcast %cst_33 : f32 to vector<8x256xf32>
    %183 = arith.subf %182, %181 : vector<8x256xf32>
    %184 = arith.mulf %176, %183 : vector<8x256xf32>
    %185 = vector.extract_strided_slice %12 {offsets = [0, 21], sizes = [8, 1], strides = [1, 1]} : vector<8x32xf32> to vector<8x1xf32>
    %186 = vector.extract_strided_slice %144 {offsets = [5, 0], sizes = [1, 256], strides = [1, 1]} : vector<8x256xf32> to vector<1x256xf32>
    %187 = vector.broadcast %185 : vector<8x1xf32> to vector<8x256xf32>
    %188 = vector.broadcast %186 : vector<1x256xf32> to vector<8x256xf32>
    %189 = arith.mulf %187, %188 : vector<8x256xf32>
    %cst_34 = arith.constant 1.000000e+00 : f32
    %190 = vector.broadcast %cst_34 : f32 to vector<8x256xf32>
    %191 = arith.subf %190, %189 : vector<8x256xf32>
    %192 = arith.mulf %184, %191 : vector<8x256xf32>
    %193 = vector.extract_strided_slice %12 {offsets = [0, 22], sizes = [8, 1], strides = [1, 1]} : vector<8x32xf32> to vector<8x1xf32>
    %194 = vector.extract_strided_slice %144 {offsets = [6, 0], sizes = [1, 256], strides = [1, 1]} : vector<8x256xf32> to vector<1x256xf32>
    %195 = vector.broadcast %193 : vector<8x1xf32> to vector<8x256xf32>
    %196 = vector.broadcast %194 : vector<1x256xf32> to vector<8x256xf32>
    %197 = arith.mulf %195, %196 : vector<8x256xf32>
    %cst_35 = arith.constant 1.000000e+00 : f32
    %198 = vector.broadcast %cst_35 : f32 to vector<8x256xf32>
    %199 = arith.subf %198, %197 : vector<8x256xf32>
    %200 = arith.mulf %192, %199 : vector<8x256xf32>
    %201 = vector.extract_strided_slice %12 {offsets = [0, 23], sizes = [8, 1], strides = [1, 1]} : vector<8x32xf32> to vector<8x1xf32>
    %202 = vector.extract_strided_slice %144 {offsets = [7, 0], sizes = [1, 256], strides = [1, 1]} : vector<8x256xf32> to vector<1x256xf32>
    %203 = vector.broadcast %201 : vector<8x1xf32> to vector<8x256xf32>
    %204 = vector.broadcast %202 : vector<1x256xf32> to vector<8x256xf32>
    %205 = arith.mulf %203, %204 : vector<8x256xf32>
    %cst_36 = arith.constant 1.000000e+00 : f32
    %206 = vector.broadcast %cst_36 : f32 to vector<8x256xf32>
    %207 = arith.subf %206, %205 : vector<8x256xf32>
    %208 = arith.mulf %200, %207 : vector<8x256xf32>
    %c24 = arith.constant 24 : index
    %c0_37 = arith.constant 0 : index
    %209 = vector.load %arg7[%c24, %c0_37] : memref<32x256xf32, #tpu.memory_space<vmem>>, vector<8x256xf32>
    %210 = vector.extract_strided_slice %12 {offsets = [0, 24], sizes = [8, 1], strides = [1, 1]} : vector<8x32xf32> to vector<8x1xf32>
    %211 = vector.extract_strided_slice %209 {offsets = [0, 0], sizes = [1, 256], strides = [1, 1]} : vector<8x256xf32> to vector<1x256xf32>
    %212 = vector.broadcast %210 : vector<8x1xf32> to vector<8x256xf32>
    %213 = vector.broadcast %211 : vector<1x256xf32> to vector<8x256xf32>
    %214 = arith.mulf %212, %213 : vector<8x256xf32>
    %cst_38 = arith.constant 1.000000e+00 : f32
    %215 = vector.broadcast %cst_38 : f32 to vector<8x256xf32>
    %216 = arith.subf %215, %214 : vector<8x256xf32>
    %217 = arith.mulf %208, %216 : vector<8x256xf32>
    %218 = vector.extract_strided_slice %12 {offsets = [0, 25], sizes = [8, 1], strides = [1, 1]} : vector<8x32xf32> to vector<8x1xf32>
    %219 = vector.extract_strided_slice %209 {offsets = [1, 0], sizes = [1, 256], strides = [1, 1]} : vector<8x256xf32> to vector<1x256xf32>
    %220 = vector.broadcast %218 : vector<8x1xf32> to vector<8x256xf32>
    %221 = vector.broadcast %219 : vector<1x256xf32> to vector<8x256xf32>
    %222 = arith.mulf %220, %221 : vector<8x256xf32>
    %cst_39 = arith.constant 1.000000e+00 : f32
    %223 = vector.broadcast %cst_39 : f32 to vector<8x256xf32>
    %224 = arith.subf %223, %222 : vector<8x256xf32>
    %225 = arith.mulf %217, %224 : vector<8x256xf32>
    %226 = vector.extract_strided_slice %12 {offsets = [0, 26], sizes = [8, 1], strides = [1, 1]} : vector<8x32xf32> to vector<8x1xf32>
    %227 = vector.extract_strided_slice %209 {offsets = [2, 0], sizes = [1, 256], strides = [1, 1]} : vector<8x256xf32> to vector<1x256xf32>
    %228 = vector.broadcast %226 : vector<8x1xf32> to vector<8x256xf32>
    %229 = vector.broadcast %227 : vector<1x256xf32> to vector<8x256xf32>
    %230 = arith.mulf %228, %229 : vector<8x256xf32>
    %cst_40 = arith.constant 1.000000e+00 : f32
    %231 = vector.broadcast %cst_40 : f32 to vector<8x256xf32>
    %232 = arith.subf %231, %230 : vector<8x256xf32>
    %233 = arith.mulf %225, %232 : vector<8x256xf32>
    %234 = vector.extract_strided_slice %12 {offsets = [0, 27], sizes = [8, 1], strides = [1, 1]} : vector<8x32xf32> to vector<8x1xf32>
    %235 = vector.extract_strided_slice %209 {offsets = [3, 0], sizes = [1, 256], strides = [1, 1]} : vector<8x256xf32> to vector<1x256xf32>
    %236 = vector.broadcast %234 : vector<8x1xf32> to vector<8x256xf32>
    %237 = vector.broadcast %235 : vector<1x256xf32> to vector<8x256xf32>
    %238 = arith.mulf %236, %237 : vector<8x256xf32>
    %cst_41 = arith.constant 1.000000e+00 : f32
    %239 = vector.broadcast %cst_41 : f32 to vector<8x256xf32>
    %240 = arith.subf %239, %238 : vector<8x256xf32>
    %241 = arith.mulf %233, %240 : vector<8x256xf32>
    %242 = vector.extract_strided_slice %12 {offsets = [0, 28], sizes = [8, 1], strides = [1, 1]} : vector<8x32xf32> to vector<8x1xf32>
    %243 = vector.extract_strided_slice %209 {offsets = [4, 0], sizes = [1, 256], strides = [1, 1]} : vector<8x256xf32> to vector<1x256xf32>
    %244 = vector.broadcast %242 : vector<8x1xf32> to vector<8x256xf32>
    %245 = vector.broadcast %243 : vector<1x256xf32> to vector<8x256xf32>
    %246 = arith.mulf %244, %245 : vector<8x256xf32>
    %cst_42 = arith.constant 1.000000e+00 : f32
    %247 = vector.broadcast %cst_42 : f32 to vector<8x256xf32>
    %248 = arith.subf %247, %246 : vector<8x256xf32>
    %249 = arith.mulf %241, %248 : vector<8x256xf32>
    %250 = vector.extract_strided_slice %12 {offsets = [0, 29], sizes = [8, 1], strides = [1, 1]} : vector<8x32xf32> to vector<8x1xf32>
    %251 = vector.extract_strided_slice %209 {offsets = [5, 0], sizes = [1, 256], strides = [1, 1]} : vector<8x256xf32> to vector<1x256xf32>
    %252 = vector.broadcast %250 : vector<8x1xf32> to vector<8x256xf32>
    %253 = vector.broadcast %251 : vector<1x256xf32> to vector<8x256xf32>
    %254 = arith.mulf %252, %253 : vector<8x256xf32>
    %cst_43 = arith.constant 1.000000e+00 : f32
    %255 = vector.broadcast %cst_43 : f32 to vector<8x256xf32>
    %256 = arith.subf %255, %254 : vector<8x256xf32>
    %257 = arith.mulf %249, %256 : vector<8x256xf32>
    %258 = vector.extract_strided_slice %12 {offsets = [0, 30], sizes = [8, 1], strides = [1, 1]} : vector<8x32xf32> to vector<8x1xf32>
    %259 = vector.extract_strided_slice %209 {offsets = [6, 0], sizes = [1, 256], strides = [1, 1]} : vector<8x256xf32> to vector<1x256xf32>
    %260 = vector.broadcast %258 : vector<8x1xf32> to vector<8x256xf32>
    %261 = vector.broadcast %259 : vector<1x256xf32> to vector<8x256xf32>
    %262 = arith.mulf %260, %261 : vector<8x256xf32>
    %cst_44 = arith.constant 1.000000e+00 : f32
    %263 = vector.broadcast %cst_44 : f32 to vector<8x256xf32>
    %264 = arith.subf %263, %262 : vector<8x256xf32>
    %265 = arith.mulf %257, %264 : vector<8x256xf32>
    %266 = vector.extract_strided_slice %12 {offsets = [0, 31], sizes = [8, 1], strides = [1, 1]} : vector<8x32xf32> to vector<8x1xf32>
    %267 = vector.extract_strided_slice %209 {offsets = [7, 0], sizes = [1, 256], strides = [1, 1]} : vector<8x256xf32> to vector<1x256xf32>
    %268 = vector.broadcast %266 : vector<8x1xf32> to vector<8x256xf32>
    %269 = vector.broadcast %267 : vector<1x256xf32> to vector<8x256xf32>
    %270 = arith.mulf %268, %269 : vector<8x256xf32>
    %cst_45 = arith.constant 1.000000e+00 : f32
    %271 = vector.broadcast %cst_45 : f32 to vector<8x256xf32>
    %272 = arith.subf %271, %270 : vector<8x256xf32>
    %273 = arith.mulf %265, %272 : vector<8x256xf32>
    %c0_46 = arith.constant 0 : index
    %c0_47 = arith.constant 0 : index
    %274 = vector.load %arg6[%c0_46, %c0_47] : memref<8x256xf32, #tpu.memory_space<vmem>>, vector<8x256xf32>
    tpu.vector_store %arg6[%c0_46, %c0_47], %273 {strides = array<i32>} : memref<8x256xf32, #tpu.memory_space<vmem>>, vector<8x256xf32>,
    %c0_i32_48 = arith.constant 0 : i32
    %275 = arith.cmpi eq, %arg2, %c0_i32_48 : i32
    %276 = arith.extui %275 : i1 to i32
    %c0_i32_49 = arith.constant 0 : i32
    %277 = arith.cmpi ne, %276, %c0_i32_49 : i32
    scf.if %277 {
      %c0_50 = arith.constant 0 : index
      %c0_51 = arith.constant 0 : index
      %278 = vector.load %arg6[%c0_50, %c0_51] : memref<8x256xf32, #tpu.memory_space<vmem>>, vector<8x256xf32>
      %c0_52 = arith.constant 0 : index
      %c0_53 = arith.constant 0 : index
      %279 = vector.load %arg5[%c0_52, %c0_53] : memref<8x256xf32, #tpu.memory_space<vmem>>, vector<8x256xf32>
      tpu.vector_store %arg5[%c0_52, %c0_53], %278 {strides = array<i32>} : memref<8x256xf32, #tpu.memory_space<vmem>>, vector<8x256xf32>,
    } else {
    }
    return
  }
  func.func @transform_0(%arg0: i32, %arg1: i32, %arg2: i32) -> (i32, i32) {
    %c0_i32 = arith.constant 0 : i32
    return %arg0, %arg2 : i32, i32
  }
  func.func @transform_1(%arg0: i32, %arg1: i32, %arg2: i32) -> (i32, i32) {
    %c0_i32 = arith.constant 0 : i32
    return %arg2, %arg1 : i32, i32
  }
  func.func @transform_2(%arg0: i32, %arg1: i32, %arg2: i32) -> (i32, i32) {
    %c0_i32 = arith.constant 0 : i32
    return %arg0, %arg1 : i32, i32
  }
}

</mosaic_0001>

<bundles_post_ra>
// kernel: quasi_selflearn_forward.1
= control target key start
LH: loop header
LB: loop body
LE: loop exit
PB: predicated region body
PF: predicated region fallthrough
CT: control target
= control target key end

     0   :  { %7 = vsyncpa [#allocation5], 0  ;;  %s746_s12 = smov [#allocation4]   ;;  %s747_s14 = smov 256   ;;  %s1098_s0 = inlined_call_operand.vmem [shape: f32[8,32], index: 0, kind: input, shape index: {}]   ;;  %s1099_s1 = inlined_call_operand.hbm [shape: f32[32,256], index: 1, kind: input, shape index: {}]   ;;  %s1100_s2 = inlined_call_operand.vmem [shape: f32[8,256], index: 2, kind: output, shape index: {}]  }
   0x1   :  { %s14_s11 = sshll.u32 %s1099_s1, 4  ;;  %s16_s13 = sshll.u32 %s746_s12, 4  ;;  %s15_s11 = int_to_ptr.hbm [resolvable:$true] %s14_s11  ;;  %s17_s13 = int_to_ptr.vmem [resolvable:$true] %s16_s13 }
   0x2   :  { %s748_s15 = smov 16  }
   0x3   :  { %22 = dma.hbm_to_vmem [thread:$0]  %s15_s11, 1024, %s17_s13, [#allocation5], %s747_s14, %s747_s14, %s748_s15  }
   0x4   :  { %744 = dma.done.wait [#allocation5], 1024  }
   0x5   :  { %745 = vsyncadd [#allocation5], 4294966272  ;;  %v749_v0 = vmov 2   ;;  %v750_v1 = vmov 0   ;;  %v751_v2 = vmov 4   ;;  %v201_v3 = vld [vmem:[%s1098_s0] sm:$0xff] }
   0x6   :  { %657 = vset.pattern.permute.xlu1 %v749_v0  ;;  %655 = vset.pattern.permute.xlu0 %v750_v1  ;;  %v802_v4 = vsub.f32 1.0, %v201_v3  ;;  %v752_v5 = vmov 3   ;;  %v753_v6 = vmov 1   ;;  %v754_v7 = vmov 5   ;;  %v33_v25 = vld [vmem:[#allocation4] sm:$0xff]  ;;  %v34_v26 = vld [vmem:[#allocation4 + $0x8] sm:$0xff] }
   0x7   :  { %659 = vset.pattern.permute.xlu2 %v751_v2  ;;  %v755_v8 = vmov 6   ;;  %v756_v9 = vmov 8   ;;  %v757_v10 = vmov 7   ;;  %v758_v11 = vmov 9   ;;  %v35_v39 = vld [vmem:[#allocation4 + $0x10] sm:$0xff]  ;;  %v36_v40 = vld [vmem:[#allocation4 + $0x18] sm:$0xff] }
   0x8   :  { %233 = vperm.xlu1 %657, %v802_v4   ;;  %209 = vperm.xlu0 %655, %v802_v4   ;;  %v759_v12 = vmov 13   ;;  %v760_v13 = vmov 10   ;;  %v761_v14 = vmov 11   ;;  %v762_v15 = vmov 18  }
   0x9   :  { %257 = vperm.xlu2 %659, %v802_v4   ;;  %v763_v16 = vmov 12   ;;  %v764_v17 = vmov 14   ;;  %v765_v18 = vmov 23   ;;  %v766_v19 = vmov 15  }
   0xa   :  { %v767_v20 = vmov 16   ;;  %v768_v21 = vmov 17   ;;  %v769_v22 = vmov 28   ;;  %v770_v23 = vmov 19  }
   0xb   :  { %v771_v24 = vmov 20   ;;  %v772_v27 = vmov 31   ;;  %v612_v28 = vmul.f32 -1.442695, %v33_v25  ;;  %v613_v29 = vmul.f32 -1.442695, %v34_v26 }
   0xc   :  { %v773_v30 = vmov 21   ;;  %v774_v31 = vmov 22   ;;  %v775_v34 = vmov 24   ;;  %v776_v35 = vmov 25  }
   0xd   :  { %688 = vpow2.f32 %v612_v28  ;;  %v777_v38 = vmov 26   ;;  %v778_v41 = vmov 27   ;;  %v614_v43 = vmul.f32 -1.442695, %v35_v39 }
   0xe   :  { %690 = vpow2.f32 %v613_v29  ;;  %v615_v45 = vmul.f32 -1.442695, %v36_v40  ;;  %v779_v48 = vmov 29   ;;  %v780_v51 = vmov 30  }
  0x10   :  { %658 = vset.pattern.permute.xlu1 %v752_v5  ;;  %656 = vset.pattern.permute.xlu0 %v753_v6 }
  0x11   :  { %245 = vperm.xlu1 %658, %v802_v4   ;;  %221 = vperm.xlu0 %656, %v802_v4  }
  0x12   :  { %660 = vset.pattern.permute.xlu2 %v754_v7  ;;  %v37_v7 = vld [vmem:[#allocation4 + $0x20] sm:$0xff] }
  0x13   :  { %269 = vperm.xlu2 %660, %v802_v4   ;;  %v689_v32 = vpop.eup %688 }
  0x14   :  { %v691_v33 = vpop.eup %690  ;;  %v65_v36 = vadd.f32 1.0, %v689_v32 }
  0x15   :  { %v66_v37 = vadd.f32 1.0, %v691_v33 }
  0x16   :  { %692 = vrcp.f32 %v65_v36  ;;  %vm78_vm0 = vweird.f32 %v65_v36  ;;  %v84_v59 = vand.u32 2147483648, %v65_v36  ;;  %v82_v63 = vand.u32 2147483647, %v65_v36 }
  0x17   :  { %694 = vrcp.f32 %v66_v37  ;;  %vm93_vm2 = vweird.f32 %v66_v37  ;;  %v99_v60 = vand.u32 2147483648, %v66_v37  ;;  %v97_v1 = vand.u32 2147483647, %v66_v37 }
  0x18   :  { %696 = vpow2.f32 %v614_v43  ;;  %v85_v3 = vor.u32 1.1754944e-38, %v84_v59  ;;  %vm83_vm6 = vcmp.eq.f32.partialorder %v82_v63, 8.507059e+37 }
  0x19   :  { %661 = vset.pattern.permute.xlu1 %v755_v8  ;;  %663 = vset.pattern.permute.xlu0 %v756_v9  ;;  %698 = vpow2.f32 %v615_v45  ;;  %v100_v5 = vor.u32 1.1754944e-38, %v99_v60  ;;  %vm98_vm7 = vcmp.eq.f32.partialorder %v97_v1, 8.507059e+37 }
  0x1a   :  { %281 = vperm.xlu1 %661, %v802_v4   ;;  %307 = vperm.xlu0 %663, %v802_v4  }
  0x1b   :  { %662 = vset.pattern.permute.xlu2 %v757_v10 }
  0x1c   :  { %293 = vperm.xlu2 %662, %v802_v4   ;;  %v693_v42 = vpop.eup %692 }
  0x1d   :  { %v695_v44 = vpop.eup %694  ;;  %v74_v46 = vmul.f32 %v693_v42, %v65_v36  ;;  %vm79_vm1 = vweird.f32 %v693_v42 }
  0x1e   :  { %v89_v47 = vmul.f32 %v695_v44, %v66_v37  ;;  %v697_v52 = vpop.eup %696  ;;  %vm94_vm3 = vweird.f32 %v695_v44  ;;  %vm842_vm4 = vmor %vm78_vm0, %vm79_vm1 }
  0x1f   :  { %v75_v49 = vsub.f32 1.0, %v74_v46  ;;  %v699_v53 = vpop.eup %698  ;;  %v837_v57 = vadd.f32 1.0, %v697_v52  ;;  %vm846_vm5 = vmor %vm93_vm2, %vm94_vm3 }
  0x20   :  { %v90_v50 = vsub.f32 1.0, %v89_v47  ;;  %v839_v58 = vadd.f32 1.0, %v699_v53 }
  0x21   :  { %v76_v55 = vmul.f32 %v693_v42, %v75_v49  ;;  %700 = vrcp.f32 %v837_v57  ;;  %vm108_vm8 = vweird.f32 %v837_v57  ;;  %v112_v63 = vand.u32 2147483647, %v837_v57 }
  0x22   :  { %664 = vset.pattern.permute.xlu1 %v758_v11  ;;  %668 = vset.pattern.permute.xlu0 %v759_v12  ;;  %v91_v56 = vmul.f32 %v695_v44, %v90_v50  ;;  %702 = vrcp.f32 %v839_v58  ;;  %vm123_vm10 = vweird.f32 %v839_v58 }
  0x23   :  { %319 = vperm.xlu1 %664, %v802_v4   ;;  %367 = vperm.xlu0 %668, %v802_v4   ;;  %v77_v61 = vadd.f32 %v693_v42, %v76_v55  ;;  %vm923_vm14 = vcmp.eq.f32.partialorder %v112_v63, 8.507059e+37 }
  0x24   :  { %665 = vset.pattern.permute.xlu2 %v760_v13  ;;  %v92_v0 = vadd.f32 %v695_v44, %v91_v56 }
  0x25   :  { %331 = vperm.xlu2 %665, %v802_v4  }
  0x26   :  { %v96_v6 = vsel %vm846_vm5, %v695_v44, %v92_v0  ;;  %v129_v0 = vand.u32 2147483648, %v839_v58 }
  0x27   :  { %v858_v11 = vpop.eup %700  ;;  %v862_v13 = vsel %vm98_vm7, %v100_v5, %v96_v6 }
  0x28   :  { %v225_v25 = vperm.slane %v862_v13, 1  ;;  %v261_v29 = vperm.slane %v862_v13, 4  ;;  %v249_v32 = vperm.slane %v862_v13, 3  ;;  %v273_v49 = vperm.slane %v862_v13, 5 }
  0x29   :  { %vm109_vm9 = vweird.f32 %v858_v11 }
  0x2a   :  { %vm906_vm12 = vmor %vm108_vm8, %vm109_vm9 }
  0x2b   :  { %666 = vset.pattern.permute.xlu1 %v761_v14  ;;  %673 = vset.pattern.permute.xlu0 %v762_v15  ;;  %v38_v14 = vld [vmem:[#allocation4 + $0x28] sm:$0xff]  ;;  %v616_v15 = vmul.f32 -1.442695, %v37_v7  ;;  %v285_v7 = vperm.slane %v862_v13, 6 }
  0x2c   :  { %343 = vperm.xlu1 %666, %v802_v4   ;;  %429 = vperm.xlu0 %673, %v802_v4  }
  0x2d   :  { %667 = vset.pattern.permute.xlu2 %v763_v16  ;;  %v864_v16 = vpop.eup %702  ;;  %704 = vpow2.f32 %v616_v15 }
  0x2e   :  { %355 = vperm.xlu2 %667, %v802_v4   ;;  %vm124_vm11 = vweird.f32 %v864_v16 }
  0x2f   :  { %vm916_vm13 = vmor %vm123_vm10, %vm124_vm11 }
  0x34   :  { %669 = vset.pattern.permute.xlu1 %v764_v17  ;;  %678 = vset.pattern.permute.xlu0 %v765_v18  ;;  %v213_v18 = vperm.slane %v862_v13, 0 }
  0x35   :  { %379 = vperm.xlu1 %669, %v802_v4   ;;  %489 = vperm.xlu0 %678, %v802_v4  }
  0x36   :  { %670 = vset.pattern.permute.xlu2 %v766_v19  ;;  %v617_v19 = vmul.f32 -1.442695, %v38_v14  ;;  %v127_v14 = vand.u32 2147483647, %v839_v58 }
  0x37   :  { %391 = vperm.xlu2 %670, %v802_v4  }
  0x38   :  { %706 = vpow2.f32 %v617_v19  ;;  %vm128_vm15 = vcmp.eq.f32.partialorder %v127_v14, 8.507059e+37 }
  0x3d   :  { %671 = vset.pattern.permute.xlu1 %v767_v20  ;;  %683 = vset.pattern.permute.xlu0 %v769_v22  ;;  %v104_v20 = vmul.f32 %v858_v11, %v837_v57 }
  0x3e   :  { %405 = vperm.xlu1 %671, %v802_v4   ;;  %551 = vperm.xlu0 %683, %v802_v4  }
  0x3f   :  { %672 = vset.pattern.permute.xlu2 %v768_v21  ;;  %v119_v21 = vmul.f32 %v864_v16, %v839_v58 }
  0x40   :  { %417 = vperm.xlu2 %672, %v802_v4  }
  0x46   :  { %674 = vset.pattern.permute.xlu1 %v770_v23  ;;  %687 = vset.pattern.permute.xlu0 %v772_v27 }
  0x47   :  { %441 = vperm.xlu1 %674, %v802_v4  }
  0x48   :  { %675 = vset.pattern.permute.xlu2 %v771_v24 }
  0x49   :  { %453 = vperm.xlu2 %675, %v802_v4  }
  0x4f   :  { %676 = vset.pattern.permute.xlu1 %v773_v30 }
  0x50   :  { %465 = vperm.xlu1 %676, %v802_v4  }
  0x51   :  { %677 = vset.pattern.permute.xlu2 %v774_v31 }
  0x52   :  { %477 = vperm.xlu2 %677, %v802_v4  }
  0x58   :  { %679 = vset.pattern.permute.xlu1 %v775_v34  ;;  %v105_v34 = vsub.f32 1.0, %v104_v20 }
  0x59   :  { %503 = vperm.xlu1 %679, %v802_v4  }
  0x5a   :  { %680 = vset.pattern.permute.xlu2 %v776_v35  ;;  %v120_v35 = vsub.f32 1.0, %v119_v21  ;;  %v106_v50 = vmul.f32 %v858_v11, %v105_v34 }
  0x5b   :  { %515 = vperm.xlu2 %680, %v802_v4  }
  0x5c   :  { %v121_v56 = vmul.f32 %v864_v16, %v120_v35 }
  0x61   :  { %681 = vset.pattern.permute.xlu1 %v777_v38 }
  0x62   :  { %527 = vperm.xlu1 %681, %v802_v4  }
  0x63   :  { %682 = vset.pattern.permute.xlu2 %v778_v41  ;;  %v835_v54 = vpop.permute.xlu2 %257  ;;  %v705_v41 = vpop.eup %704 }
  0x64   :  { %539 = vperm.xlu2 %682, %v802_v4   ;;  %v263_v45 = vmul.f32 %v261_v29, %v835_v54  ;;  %v707_v52 = vpop.eup %706  ;;  %v297_v29 = vperm.slane %v862_v13, 7 }
  0x65   :  { %v898_v5 = vadd.f32 1.0, %v707_v52 }
  0x67   :  { %vm153_vm2 = vweird.f32 %v898_v5 }
  0x6a   :  { %684 = vset.pattern.permute.xlu1 %v779_v48 }
  0x6b   :  { %563 = vperm.xlu1 %684, %v802_v4  }
  0x6c   :  { %685 = vset.pattern.permute.xlu2 %v780_v51  ;;  %v114_v51 = vand.u32 2147483648, %v837_v57 }
  0x6d   :  { %575 = vperm.xlu2 %685, %v802_v4   ;;  %v856_v8 = vpop.permute.xlu2 %269 }
  0x6e   :  { %v275_v20 = vmul.f32 %v273_v49, %v856_v8 }
  0x73   :  { %686 = vset.pattern.permute.xlu1 %v772_v27  ;;  %v237_v27 = vperm.slane %v862_v13, 2 }
  0x74   :  { %587 = vperm.xlu1 %686, %v802_v4   ;;  %v81_v4 = vsel %vm842_vm4, %v693_v42, %v77_v61 }
  0x75   :  { %v860_v12 = vsel %vm83_vm6, %v85_v3, %v81_v4  ;;  %v107_v3 = vadd.f32 %v858_v11, %v106_v50 }
  0x76   :  { %v212_v17 = vperm.slane %v860_v12, 0  ;;  %v224_v24 = vperm.slane %v860_v12, 1  ;;  %v236_v26 = vperm.slane %v860_v12, 2  ;;  %v260_v28 = vperm.slane %v860_v12, 4  ;;  %v880_v40 = vpop.permute.xlu2 %293 }
  0x77   :  { %v248_v31 = vperm.slane %v860_v12, 3  ;;  %v272_v48 = vperm.slane %v860_v12, 5  ;;  %v284_v6 = vperm.slane %v860_v12, 6  ;;  %v111_v58 = vsel %vm906_vm12, %v858_v11, %v107_v3 }
  0x78   :  { %v262_v44 = vmul.f32 %v260_v28, %v835_v54  ;;  %v891_v54 = vadd.f32 1.0, %v705_v41  ;;  %v296_v28 = vperm.slane %v860_v12, 7 }
  0x79   :  { %v274_v57 = vmul.f32 %v272_v48, %v856_v8 }
  0x7a   :  { %v234_v9 = vpop.permute.xlu1 %233  ;;  %v210_v10 = vpop.permute.xlu0 %209  ;;  %708 = vrcp.f32 %v891_v54  ;;  %v264_v8 = vsub.f32 1.0, %v262_v44  ;;  %v298_v12 = vmul.f32 %v296_v28, %v880_v40  ;;  %vm138_vm0 = vweird.f32 %v891_v54 }
  0x7b   :  { %v214_v22 = vmul.f32 %v212_v17, %v210_v10  ;;  %v215_v23 = vmul.f32 %v213_v18, %v210_v10  ;;  %v238_v42 = vmul.f32 %v236_v26, %v234_v9  ;;  %v239_v43 = vmul.f32 %v237_v27, %v234_v9 }
  0x7c   :  { %v122_v10 = vadd.f32 %v864_v16, %v121_v56  ;;  %v115_v18 = vor.u32 1.1754944e-38, %v114_v51  ;;  %710 = vrcp.f32 %v898_v5  ;;  %v265_v27 = vsub.f32 1.0, %v263_v45 }
  0x7d   :  { %v216_v36 = vsub.f32 1.0, %v214_v22  ;;  %v217_v37 = vsub.f32 1.0, %v215_v23  ;;  %v240_v59 = vsub.f32 1.0, %v238_v42  ;;  %v241_v60 = vsub.f32 1.0, %v239_v43 }
  0x7e   :  { %v130_v22 = vor.u32 1.1754944e-38, %v129_v0  ;;  %v126_v26 = vsel %vm916_vm13, %v864_v16, %v122_v10  ;;  %v299_v42 = vmul.f32 %v297_v29, %v880_v40  ;;  %v159_v28 = vand.u32 2147483648, %v898_v5 }
  0x7f   :  { %v332_v23 = vpop.permute.xlu2 %331 }
  0x80   :  { %v940_v11 = vpop.eup %708  ;;  %v942_v16 = vsel %vm128_vm15, %v130_v22, %v126_v26 }
  0x81   :  { %v311_v43 = vperm.slane %v942_v16, 0  ;;  %v134_v44 = vmul.f32 %v940_v11, %v891_v54  ;;  %v323_v40 = vperm.slane %v942_v16, 1  ;;  %v359_v14 = vperm.slane %v942_v16, 4 }
  0x82   :  { %vm139_vm1 = vweird.f32 %v940_v11 }
  0x83   :  { %v246_v30 = vpop.permute.xlu1 %245  ;;  %v222_v33 = vpop.permute.xlu0 %221  ;;  %v135_v63 = vsub.f32 1.0, %v134_v44  ;;  %vm980_vm4 = vmor %vm138_vm0, %vm139_vm1 }
  0x84   :  { %v226_v38 = vmul.f32 %v224_v24, %v222_v33  ;;  %v227_v39 = vmul.f32 %v225_v25, %v222_v33  ;;  %v250_v61 = vmul.f32 %v248_v31, %v246_v30  ;;  %v251_v62 = vmul.f32 %v249_v32, %v246_v30 }
  0x85   :  { %v276_v30 = vsub.f32 1.0, %v274_v57  ;;  %v277_v31 = vsub.f32 1.0, %v275_v20  ;;  %v938_v33 = vsel %vm923_vm14, %v115_v18, %v111_v58  ;;  %v136_v57 = vmul.f32 %v940_v11, %v135_v63 }
  0x86   :  { %v228_v46 = vsub.f32 1.0, %v226_v38  ;;  %v229_v47 = vsub.f32 1.0, %v227_v39  ;;  %v252_v15 = vsub.f32 1.0, %v250_v61  ;;  %v253_v17 = vsub.f32 1.0, %v251_v62  ;;  %v944_v38 = vpop.eup %710 }
  0x87   :  { %v310_v13 = vperm.slane %v938_v33, 0  ;;  %v322_v50 = vperm.slane %v938_v33, 1  ;;  %v149_v52 = vmul.f32 %v944_v38, %v898_v5  ;;  %v334_v56 = vperm.slane %v938_v33, 2 }
  0x88   :  { %v230_v53 = vmul.f32 %v228_v46, %v216_v36  ;;  %v231_v55 = vmul.f32 %v229_v47, %v217_v37  ;;  %v39_v37 = vld [vmem:[#allocation4 + $0x30] sm:$0xff]  ;;  %v356_v51 = vpop.permute.xlu2 %355  ;;  %v346_v3 = vperm.slane %v938_v33, 3  ;;  %v370_v19 = vperm.slane %v938_v33, 5 }
  0x89   :  { %v618_v49 = vmul.f32 -1.442695, %v39_v37  ;;  %vm154_vm3 = vweird.f32 %v944_v38 }
  0x8a   :  { %v242_v1 = vmul.f32 %v240_v59, %v230_v53  ;;  %v243_v2 = vmul.f32 %v241_v60, %v231_v55  ;;  %v40_v53 = vld [vmem:[#allocation4 + $0x38] sm:$0xff]  ;;  %v300_v55 = vsub.f32 1.0, %v298_v12  ;;  %v335_v59 = vperm.slane %v942_v16, 2  ;;  %vm990_vm5 = vmor %vm153_vm2, %vm154_vm3 }
  0x8b   :  { %v301_v60 = vsub.f32 1.0, %v299_v42  ;;  %712 = vpow2.f32 %v618_v49 }
  0x8c   :  { %v282_v4 = vpop.permute.xlu1 %281  ;;  %v254_v24 = vmul.f32 %v252_v15, %v242_v1  ;;  %v255_v25 = vmul.f32 %v253_v17, %v243_v2  ;;  %v308_v48 = vpop.permute.xlu0 %307  ;;  %v619_v2 = vmul.f32 -1.442695, %v40_v53  ;;  %v336_v15 = vmul.f32 %v334_v56, %v332_v23 }
  0x8d   :  { %v286_v32 = vmul.f32 %v284_v6, %v282_v4  ;;  %v287_v36 = vmul.f32 %v285_v7, %v282_v4  ;;  %v312_v61 = vmul.f32 %v310_v13, %v308_v48  ;;  %v313_v62 = vmul.f32 %v311_v43, %v308_v48 }
  0x8e   :  { %v266_v34 = vmul.f32 %v264_v8, %v254_v24  ;;  %v267_v35 = vmul.f32 %v265_v27, %v255_v25  ;;  %v347_v4 = vperm.slane %v942_v16, 3  ;;  %v358_v6 = vperm.slane %v938_v33, 4 }
  0x8f   :  { %v288_v41 = vsub.f32 1.0, %v286_v32  ;;  %v289_v47 = vsub.f32 1.0, %v287_v36  ;;  %v150_v7 = vsub.f32 1.0, %v149_v52  ;;  %714 = vpow2.f32 %v619_v2 }
  0x90   :  { %v278_v45 = vmul.f32 %v276_v30, %v266_v34  ;;  %v279_v46 = vmul.f32 %v277_v31, %v267_v35  ;;  %v337_v17 = vmul.f32 %v335_v59, %v332_v23  ;;  %v314_v22 = vsub.f32 1.0, %v312_v61 }
  0x91   :  { %v315_v24 = vsub.f32 1.0, %v313_v62  ;;  %v371_v25 = vperm.slane %v942_v16, 5  ;;  %v151_v58 = vmul.f32 %v944_v38, %v150_v7  ;;  %v713_v26 = vpop.eup %712  ;;  %v144_v27 = vand.u32 2147483648, %v891_v54  ;;  %v970_v29 = vpop.permute.xlu2 %391 }
  0x92   :  { %v290_v0 = vmul.f32 %v288_v41, %v278_v45  ;;  %v291_v1 = vmul.f32 %v289_v47, %v279_v46  ;;  %v137_v30 = vadd.f32 %v940_v11, %v136_v57  ;;  %v142_v31 = vand.u32 2147483647, %v891_v54 }
  0x93   :  { %v338_v13 = vsub.f32 1.0, %v336_v15  ;;  %v157_v41 = vand.u32 2147483647, %v898_v5  ;;  %v986_v42 = vadd.f32 1.0, %v713_v26  ;;  %v339_v45 = vsub.f32 1.0, %v337_v17 }
  0x94   :  { %v302_v20 = vmul.f32 %v300_v55, %v290_v0  ;;  %v303_v21 = vmul.f32 %v301_v60, %v291_v1  ;;  %v360_v47 = vmul.f32 %v358_v6, %v356_v51  ;;  %v361_v48 = vmul.f32 %v359_v14, %v356_v51 }
  0x95   :  { %v320_v39 = vpop.permute.xlu1 %319  ;;  %v715_v32 = vpop.eup %714  ;;  %v141_v49 = vsel %vm980_vm4, %v940_v11, %v137_v30  ;;  %vm143_vm6 = vcmp.eq.f32.partialorder %v142_v31, 8.507059e+37  ;;  %v160_v56 = vor.u32 1.1754944e-38, %v159_v28  ;;  %v382_v5 = vperm.slane %v938_v33, 6 }
  0x96   :  { %v324_v9 = vmul.f32 %v322_v50, %v320_v39  ;;  %v325_v10 = vmul.f32 %v323_v40, %v320_v39  ;;  %v316_v34 = vmul.f32 %v314_v22, %v302_v20  ;;  %v317_v35 = vmul.f32 %v315_v24, %v303_v21  ;;  %v368_v55 = vpop.permute.xlu0 %367 }
  0x97   :  { %v152_v39 = vadd.f32 %v944_v38, %v151_v58  ;;  %v994_v54 = vadd.f32 1.0, %v715_v32  ;;  %v145_v50 = vor.u32 1.1754944e-38, %v144_v27  ;;  %vm158_vm7 = vcmp.eq.f32.partialorder %v157_v41, 8.507059e+37 }
  0x98   :  { %v326_v8 = vsub.f32 1.0, %v324_v9  ;;  %v327_v23 = vsub.f32 1.0, %v325_v10  ;;  %716 = vrcp.f32 %v986_v42  ;;  %v383_v11 = vperm.slane %v942_v16, 6 }
  0x99   :  { %v156_v59 = vsel %vm990_vm5, %v944_v38, %v152_v39  ;;  %718 = vrcp.f32 %v994_v54  ;;  %v362_v61 = vsub.f32 1.0, %v360_v47  ;;  %v363_v62 = vsub.f32 1.0, %v361_v48 }
  0x9a   :  { %v328_v43 = vmul.f32 %v326_v8, %v316_v34  ;;  %v329_v44 = vmul.f32 %v327_v23, %v317_v35  ;;  %v372_v63 = vmul.f32 %v370_v19, %v368_v55  ;;  %v1006_v0 = vsel %vm143_vm6, %v145_v50, %v141_v49  ;;  %v418_v38 = vpop.permute.xlu2 %417 }
  0x9b   :  { %v394_v9 = vperm.slane %v938_v33, 7  ;;  %v395_v10 = vperm.slane %v942_v16, 7  ;;  %v408_v15 = vperm.slane %v1006_v0, 0  ;;  %v420_v16 = vperm.slane %v1006_v0, 1 }
  0x9c   :  { %v340_v51 = vmul.f32 %v338_v13, %v328_v43  ;;  %v341_v60 = vmul.f32 %v339_v45, %v329_v44  ;;  %v374_v20 = vsub.f32 1.0, %v372_v63  ;;  %v432_v32 = vperm.slane %v1006_v0, 2 }
  0x9d   :  { %v396_v58 = vmul.f32 %v394_v9, %v970_v29  ;;  %v397_v33 = vmul.f32 %v395_v10, %v970_v29  ;;  %v422_v13 = vmul.f32 %v420_v16, %v418_v38  ;;  %v444_v49 = vperm.slane %v1006_v0, 3 }
  0x9e   :  { %v344_v18 = vpop.permute.xlu1 %343  ;;  %v1012_v14 = vpop.eup %716  ;;  %vm168_vm8 = vweird.f32 %v986_v42  ;;  %vm183_vm10 = vweird.f32 %v994_v54  ;;  %v187_v10 = vand.u32 2147483647, %v994_v54 }
  0x9f   :  { %v348_v36 = vmul.f32 %v346_v3, %v344_v18  ;;  %v349_v37 = vmul.f32 %v347_v4, %v344_v18  ;;  %v373_v3 = vmul.f32 %v371_v25, %v368_v55  ;;  %v1008_v4 = vsel %vm158_vm7, %v160_v56, %v156_v59  ;;  %v1016_v18 = vpop.eup %718  ;;  %v430_v12 = vpop.permute.xlu0 %429 }
  0xa0   :  { %v409_v17 = vperm.slane %v1008_v4, 0  ;;  %v421_v26 = vperm.slane %v1008_v4, 1  ;;  %v164_v8 = vmul.f32 %v1012_v14, %v986_v42  ;;  %v179_v23 = vmul.f32 %v1016_v18, %v994_v54 }
  0xa1   :  { %v350_v52 = vsub.f32 1.0, %v348_v36  ;;  %v351_v53 = vsub.f32 1.0, %v349_v37  ;;  %v375_v21 = vsub.f32 1.0, %v373_v3  ;;  %v433_v34 = vperm.slane %v1008_v4, 2 }
  0xa2   :  { %v398_v36 = vsub.f32 1.0, %v396_v58  ;;  %v399_v37 = vsub.f32 1.0, %v397_v33  ;;  %v423_v39 = vmul.f32 %v421_v26, %v418_v38  ;;  %v165_v43 = vsub.f32 1.0, %v164_v8 }
  0xa3   :  { %v352_v1 = vmul.f32 %v350_v52, %v340_v51  ;;  %v353_v2 = vmul.f32 %v351_v53, %v341_v60  ;;  %v454_v41 = vpop.permute.xlu2 %453  ;;  %v180_v44 = vsub.f32 1.0, %v179_v23  ;;  %v434_v47 = vmul.f32 %v432_v32, %v430_v12 }
  0xa4   :  { %v435_v48 = vmul.f32 %v433_v34, %v430_v12  ;;  %v445_v50 = vperm.slane %v1008_v4, 3  ;;  %v457_v56 = vperm.slane %v1008_v4, 4  ;;  %v425_v59 = vsub.f32 1.0, %v423_v39 }
  0xa5   :  { %v364_v19 = vmul.f32 %v362_v61, %v352_v1  ;;  %v365_v57 = vmul.f32 %v363_v62, %v353_v2  ;;  %v166_v51 = vmul.f32 %v1012_v14, %v165_v43  ;;  %v181_v60 = vmul.f32 %v1016_v18, %v180_v44 }
  0xa6   :  { %vm169_vm9 = vweird.f32 %v1012_v14  ;;  %v436_v62 = vsub.f32 1.0, %v434_v47  ;;  %v437_v63 = vsub.f32 1.0, %v435_v48  ;;  %vm184_vm11 = vweird.f32 %v1016_v18 }
  0xa7   :  { %v380_v40 = vpop.permute.xlu1 %379  ;;  %v376_v27 = vmul.f32 %v374_v20, %v364_v19  ;;  %v377_v28 = vmul.f32 %v375_v21, %v365_v57  ;;  %v172_v3 = vand.u32 2147483647, %v986_v42  ;;  %v174_v38 = vand.u32 2147483648, %v986_v42  ;;  %vm1041_vm12 = vmor %vm168_vm8, %vm169_vm9 }
  0xa8   :  { %v384_v6 = vmul.f32 %v382_v5, %v380_v40  ;;  %v385_v7 = vmul.f32 %v383_v11, %v380_v40  ;;  %v456_v40 = vperm.slane %v1006_v0, 4  ;;  %v424_v5 = vsub.f32 1.0, %v422_v13  ;;  %vm1052_vm13 = vmor %vm183_vm10, %vm184_vm11 }
  0xa9   :  { %v182_v9 = vadd.f32 %v1016_v18, %v181_v60  ;;  %v468_v57 = vperm.slane %v1006_v0, 5  ;;  %v469_v20 = vperm.slane %v1008_v4, 5  ;;  %v481_v58 = vperm.slane %v1008_v4, 6 }
  0xaa   :  { %v386_v24 = vsub.f32 1.0, %v384_v6  ;;  %v387_v25 = vsub.f32 1.0, %v385_v7  ;;  %v167_v6 = vadd.f32 %v1012_v14, %v166_v51  ;;  %v458_v21 = vmul.f32 %v456_v40, %v454_v41 }
  0xab   :  { %vm1058_vm14 = vcmp.eq.f32.partialorder %v172_v3, 8.507059e+37  ;;  %v175_v8 = vor.u32 1.1754944e-38, %v174_v38  ;;  %vm188_vm15 = vcmp.eq.f32.partialorder %v187_v10, 8.507059e+37  ;;  %v492_v12 = vperm.slane %v1006_v0, 7 }
  0xac   :  { %v388_v35 = vmul.f32 %v386_v24, %v376_v27  ;;  %v389_v29 = vmul.f32 %v387_v25, %v377_v28  ;;  %v478_v24 = vpop.permute.xlu2 %477  ;;  %v480_v25 = vperm.slane %v1006_v0, 6  ;;  %v186_v27 = vsel %vm1052_vm13, %v1016_v18, %v182_v9 }
  0xad   :  { %v493_v13 = vperm.slane %v1008_v4, 7  ;;  %v483_v44 = vmul.f32 %v481_v58, %v478_v24 }
  0xae   :  { %v400_v52 = vmul.f32 %v398_v36, %v388_v35  ;;  %v401_v53 = vmul.f32 %v399_v37, %v389_v29  ;;  %v460_v36 = vsub.f32 1.0, %v458_v21  ;;  %v482_v43 = vmul.f32 %v480_v25, %v478_v24 }
  0xaf   :  { %v485_v40 = vsub.f32 1.0, %v483_v44 }
  0xb0   :  { %v406_v22 = vpop.permute.xlu1 %405 }
  0xb1   :  { %v410_v30 = vmul.f32 %v408_v15, %v406_v22  ;;  %v411_v31 = vmul.f32 %v409_v17, %v406_v22  ;;  %v189_v15 = vand.u32 2147483648, %v994_v54  ;;  %v459_v22 = vmul.f32 %v457_v56, %v454_v41 }
  0xb2   :  { %v171_v54 = vsel %vm1041_vm12, %v1012_v14, %v167_v6 }
  0xb3   :  { %v412_v45 = vsub.f32 1.0, %v410_v30  ;;  %v413_v46 = vsub.f32 1.0, %v411_v31  ;;  %v190_v28 = vor.u32 1.1754944e-38, %v189_v15  ;;  %v461_v37 = vsub.f32 1.0, %v459_v22 }
  0xb4   :  { %v1072_v14 = vsel %vm1058_vm14, %v175_v8, %v171_v54 }
  0xb5   :  { %v414_v11 = vmul.f32 %v412_v45, %v400_v52  ;;  %v415_v61 = vmul.f32 %v413_v46, %v401_v53  ;;  %v1074_v39 = vsel %vm188_vm15, %v190_v28, %v186_v27  ;;  %v490_v45 = vpop.permute.xlu0 %489  ;;  %v506_v48 = vperm.slane %v1072_v14, 0  ;;  %v516_v4 = vpop.permute.xlu2 %515 }
  0xb6   :  { %v494_v0 = vmul.f32 %v492_v12, %v490_v45  ;;  %v530_v6 = vperm.slane %v1072_v14, 2  ;;  %v531_v7 = vperm.slane %v1074_v39, 2  ;;  %v542_v15 = vperm.slane %v1072_v14, 3 }
  0xb7   :  { %v426_v17 = vmul.f32 %v424_v5, %v414_v11  ;;  %v427_v19 = vmul.f32 %v425_v59, %v415_v61  ;;  %v518_v5 = vperm.slane %v1072_v14, 1  ;;  %v519_v59 = vperm.slane %v1074_v39, 1 }
  0xb8   :  { %v554_v58 = vperm.slane %v1072_v14, 4 }
  0xb9   :  { %v442_v55 = vpop.permute.xlu1 %441  ;;  %v438_v30 = vmul.f32 %v436_v62, %v426_v17  ;;  %v439_v31 = vmul.f32 %v437_v63, %v427_v19  ;;  %v496_v62 = vsub.f32 1.0, %v494_v0  ;;  %v543_v17 = vperm.slane %v1074_v39, 3 }
  0xba   :  { %v446_v1 = vmul.f32 %v444_v49, %v442_v55  ;;  %v447_v2 = vmul.f32 %v445_v50, %v442_v55  ;;  %v507_v49 = vperm.slane %v1074_v39, 0  ;;  %v495_v50 = vmul.f32 %v493_v13, %v490_v45 }
  0xbb   :  { %v484_v55 = vsub.f32 1.0, %v482_v43  ;;  %v578_v13 = vperm.slane %v1072_v14, 6 }
  0xbc   :  { %v448_v33 = vsub.f32 1.0, %v446_v1  ;;  %v449_v16 = vsub.f32 1.0, %v447_v2  ;;  %v497_v63 = vsub.f32 1.0, %v495_v50  ;;  %v520_v1 = vmul.f32 %v518_v5, %v516_v4 }
  0xbd   :  { %v521_v2 = vmul.f32 %v519_v59, %v516_v4  ;;  %v552_v54 = vpop.permute.xlu0 %551 }
  0xbe   :  { %v450_v35 = vmul.f32 %v448_v33, %v438_v30  ;;  %v451_v29 = vmul.f32 %v449_v16, %v439_v31  ;;  %v522_v19 = vsub.f32 1.0, %v520_v1  ;;  %v540_v42 = vpop.permute.xlu2 %539  ;;  %v555_v33 = vperm.slane %v1074_v39, 4 }
  0xbf   :  { %v544_v8 = vmul.f32 %v542_v15, %v540_v42  ;;  %v556_v30 = vmul.f32 %v554_v58, %v552_v54 }
  0xc0   :  { %v462_v46 = vmul.f32 %v460_v36, %v450_v35  ;;  %v463_v47 = vmul.f32 %v461_v37, %v451_v29  ;;  %v557_v31 = vmul.f32 %v555_v33, %v552_v54 }
  0xc1   :  { %v546_v36 = vsub.f32 1.0, %v544_v8 }
  0xc2   :  { %v466_v23 = vpop.permute.xlu1 %465 }
  0xc3   :  { %v470_v32 = vmul.f32 %v468_v57, %v466_v23  ;;  %v471_v34 = vmul.f32 %v469_v20, %v466_v23  ;;  %v523_v57 = vsub.f32 1.0, %v521_v2  ;;  %v545_v23 = vmul.f32 %v543_v17, %v540_v42 }
  0xc5   :  { %v472_v18 = vsub.f32 1.0, %v470_v32  ;;  %v473_v41 = vsub.f32 1.0, %v471_v34  ;;  %v566_v32 = vperm.slane %v1072_v14, 5  ;;  %v567_v34 = vperm.slane %v1074_v39, 5 }
  0xc6   :  { %v547_v37 = vsub.f32 1.0, %v545_v23 }
  0xc7   :  { %v474_v52 = vmul.f32 %v472_v18, %v462_v46  ;;  %v475_v53 = vmul.f32 %v473_v41, %v463_v47  ;;  %v579_v18 = vperm.slane %v1074_v39, 6  ;;  %v576_v44 = vpop.permute.xlu2 %575  ;;  %v558_v47 = vsub.f32 1.0, %v556_v30 }
  0xc8   :  { %v580_v50 = vmul.f32 %v578_v13, %v576_v44 }
  0xc9   :  { %v486_v11 = vmul.f32 %v484_v55, %v474_v52  ;;  %v487_v61 = vmul.f32 %v485_v40, %v475_v53  ;;  %v581_v4 = vmul.f32 %v579_v18, %v576_v44  ;;  %v590_v55 = vperm.slane %v1072_v14, 7 }
  0xca   :  { %v591_v40 = vperm.slane %v1074_v39, 7  ;;  %v582_v59 = vsub.f32 1.0, %v580_v50 }
  0xcb   :  { %v504_v56 = vpop.permute.xlu1 %503  ;;  %v498_v9 = vmul.f32 %v496_v62, %v486_v11  ;;  %v499_v10 = vmul.f32 %v497_v63, %v487_v61 }
  0xcc   :  { %v508_v51 = vmul.f32 %v506_v48, %v504_v56  ;;  %v509_v60 = vmul.f32 %v507_v49, %v504_v56  ;;  %v559_v48 = vsub.f32 1.0, %v557_v31 }
  0xce   :  { %v510_v3 = vsub.f32 1.0, %v508_v51  ;;  %v511_v38 = vsub.f32 1.0, %v509_v60  ;;  %v583_v51 = vsub.f32 1.0, %v581_v4 }
  0xd0   :  { %v512_v21 = vmul.f32 %v510_v3, %v498_v9  ;;  %v513_v22 = vmul.f32 %v511_v38, %v499_v10 }
  0xd2   :  { %v524_v27 = vmul.f32 %v522_v19, %v512_v21  ;;  %v525_v28 = vmul.f32 %v523_v57, %v513_v22 }
  0xd4   :  { %v528_v20 = vpop.permute.xlu1 %527 }
  0xd5   :  { %v532_v24 = vmul.f32 %v530_v6, %v528_v20  ;;  %v533_v25 = vmul.f32 %v531_v7, %v528_v20 }
  0xd7   :  { %v534_v16 = vsub.f32 1.0, %v532_v24  ;;  %v535_v26 = vsub.f32 1.0, %v533_v25 }
  0xd9   :  { %v536_v35 = vmul.f32 %v534_v16, %v524_v27  ;;  %v537_v29 = vmul.f32 %v535_v26, %v525_v28 }
  0xdb   :  { %v548_v45 = vmul.f32 %v546_v36, %v536_v35  ;;  %v549_v46 = vmul.f32 %v547_v37, %v537_v29 }
  0xdd   :  { %v564_v12 = vpop.permute.xlu1 %563  ;;  %v560_v52 = vmul.f32 %v558_v47, %v548_v45  ;;  %v561_v53 = vmul.f32 %v559_v48, %v549_v46 }
  0xde   :  { %v568_v41 = vmul.f32 %v566_v32, %v564_v12  ;;  %v569_v43 = vmul.f32 %v567_v34, %v564_v12 }
  0xe0   :  { %v570_v49 = vsub.f32 1.0, %v568_v41  ;;  %v571_v0 = vsub.f32 1.0, %v569_v43 }
  0xe2   :  { %v572_v56 = vmul.f32 %v570_v49, %v560_v52  ;;  %v573_v5 = vmul.f32 %v571_v0, %v561_v53 }
  0xe4   :  { %v584_v62 = vmul.f32 %v582_v59, %v572_v56  ;;  %v585_v63 = vmul.f32 %v583_v51, %v573_v5 }
  0xe6   :  { %v588_v60 = vpop.permute.xlu1 %587 }
  0xe7   :  { %v592_v11 = vmul.f32 %v590_v55, %v588_v60  ;;  %v593_v61 = vmul.f32 %v591_v40, %v588_v60 }
  0xe9   :  { %v594_v1 = vsub.f32 1.0, %v592_v11  ;;  %v595_v2 = vsub.f32 1.0, %v593_v61 }
  0xeb   :  { %v596_v3 = vmul.f32 %v594_v1, %v584_v62  ;;  %v597_v38 = vmul.f32 %v595_v2, %v585_v63 }
  0xed   :  { %605 = vst [vmem:[%s1100_s2] sm:$0xff] %v596_v3 }
  0xee   :  { %606 = vst [vmem:[%s1100_s2 + $0x8] sm:$0xff] %v597_v38 }
  0xef   :  { %611 = vsyncpa [#allocation5], 1 }

</bundles_post_ra>
